<compile_context>
chip_gen: v7x
topology: tpu7x:2x2x1
jax: 0.10.0
libtpu: 0.0.40
codegen_flags: <defaults>
</compile_context>

<pallas_src>
import functools

import jax
import jax.numpy as jnp
from jax import lax
from jax.experimental import pallas as pl
from jax.experimental.pallas import tpu as pltpu


_LANES = 128
_INNER_ROWS = 256                 # rolling-accumulator sub-slice (rows)
_TARGET_BLOCK_BYTES = 4 << 20     # ~4 MiB per input per grid step (v7x-safe)
_VMEM_LIMIT_BYTES = 48 << 20      # > v5e 16 MiB scoped default, < v7x 64 MiB physical
_PALLAS_MIN_ELEMENTS = 1 << 19    # ~0.5M elems: below this the fused XLA path wins


def _round_up(x, m):
    return ((x + m - 1) // m) * m


def _plan(rows, itemsize):
    """Choose (block_rows, inner_rows, grid_n) for a [rows, 128] reduce."""
    if rows < 2 * _INNER_ROWS:
        # Single small block. 32-row rounding respects the native sublane tile
        # of f32 (8), bf16 (16) and int8/fp8 (32).
        block_rows = _round_up(rows, 32)
        return block_rows, block_rows, 1

    target_rows = max(_INNER_ROWS, _TARGET_BLOCK_BYTES // (_LANES * itemsize))
    grid_n = pl.cdiv(rows, target_rows)
    # v7x has 2 TensorCores: keep at least 2 chunks and an even count so the
    # "parallel" grid axis splits evenly (near-neutral on v5e/v6e).
    grid_n = max(grid_n, 2)
    if grid_n % 2:
        grid_n += 1
    block_rows = _round_up(pl.cdiv(rows, grid_n), _INNER_ROWS)
    grid_n = pl.cdiv(rows, block_rows)   # may drop by one for huge inputs; acceptable
    return block_rows, _INNER_ROWS, grid_n


def _sq_diff_partial_kernel(pred_ref, gt_ref, out_ref, *,
                            block_rows, inner_rows, total_rows):
    """Per-chunk partial sum of squared differences.

    pred_ref/gt_ref: (block_rows, 128) tiles.
    out_ref: (1, 8, 128) per-chunk partial-sum tile (one full vreg, unmasked store).
    """
    i = pl.program_id(0)
    base_row = i * block_rows
    nchunks = block_rows // inner_rows
    # Hoisted once; per-iteration we only add a scalar offset.
    row_iota = lax.broadcasted_iota(jnp.int32, (inner_rows, _LANES), 0)

    def body(c, acc):
        r0 = pl.multiple_of(c * inner_rows, 32)
        p = pred_ref[pl.ds(r0, inner_rows), :]
        g = gt_ref[pl.ds(r0, inner_rows), :]
        if p.dtype != jnp.float32:
            p = p.astype(jnp.float32)
        if g.dtype != jnp.float32:
            g = g.astype(jnp.float32)
        d = g - p
        sq = d * d
        # Rows past the logical end (only possible in the last grid step / last
        # chunk) hold unspecified garbage: select them to 0 before reducing.
        # Unconditional (no pl.when gate): a compare+select per vreg is free
        # given the huge VPU slack in this DMA-bound kernel.
        valid = (base_row + r0 + row_iota) < total_rows
        sq = jnp.where(valid, sq, 0.0)
        # Sublane-grouped reduce: pure VPU adds of (8,128) vregs, no XLU needed.
        return acc + sq.reshape(inner_rows // 8, 8, _LANES).sum(axis=0)

    acc = lax.fori_loop(0, nchunks, body, jnp.zeros((8, _LANES), jnp.float32))
    out_ref[0] = acc


def _pallas_sum_sq_diff(pred, gt):
    """Total sum of (gt - pred)^2 over all elements, via a tiled Pallas reduce."""
    total = pred.size
    itemsize = jnp.dtype(pred.dtype).itemsize
    main = (total // _LANES) * _LANES          # 128-aligned prefix -> Pallas
    rows = main // _LANES

    flat_p = jnp.reshape(pred, (-1,))
    flat_g = jnp.reshape(gt, (-1,))

    acc = jnp.float32(0.0)

    if main:
        if main == total:
            p2d = flat_p.reshape(rows, _LANES)     # free bitcast, zero copies
            g2d = flat_g.reshape(rows, _LANES)
        else:
            # Aligned-prefix slice; strictly cheaper than the old full jnp.pad
            # (no pad writes), tail handled below in XLA.
            p2d = flat_p[:main].reshape(rows, _LANES)
            g2d = flat_g[:main].reshape(rows, _LANES)

        block_rows, inner_rows, grid_n = _plan(rows, itemsize)

        kernel = functools.partial(
            _sq_diff_partial_kernel,
            block_rows=block_rows, inner_rows=inner_rows, total_rows=rows)

        cost = pl.CostEstimate(
            flops=3 * main,
            transcendentals=0,
            bytes_accessed=2 * main * itemsize + grid_n * 8 * _LANES * 4)

        partials = pl.pallas_call(
            kernel,
            out_shape=jax.ShapeDtypeStruct((grid_n, 8, _LANES), jnp.float32),
            grid_spec=pltpu.PrefetchScalarGridSpec(
                num_scalar_prefetch=0,
                grid=(grid_n,),
                in_specs=[
                    pl.BlockSpec((block_rows, _LANES), lambda i: (i, 0)),
                    pl.BlockSpec((block_rows, _LANES), lambda i: (i, 0)),
                ],
                out_specs=pl.BlockSpec((1, 8, _LANES), lambda i: (i, 0, 0)),
            ),
            compiler_params=pltpu.CompilerParams(
                dimension_semantics=("parallel",),     # independent chunks; v7x dual-TC split
                vmem_limit_bytes=_VMEM_LIMIT_BYTES,
            ),
            cost_estimate=cost,
        )(p2d, g2d)

        # Tiny cross-chunk tree reduce in XLA (bounds f32 accumulation error).
        acc = jnp.sum(partials, dtype=jnp.float32)

    if main != total:
        # Sub-128-element ragged tail: negligible, fused XLA reduce.
        tp = flat_p[main:].astype(jnp.float32)
        tg = flat_g[main:].astype(jnp.float32)
        acc = acc + jnp.sum((tg - tp) ** 2)

    return acc


def _as_stacked(x):
    if isinstance(x, (list, tuple)):
        return jnp.stack([jnp.asarray(v) for v in x], axis=0)
    return jnp.asarray(x)


def calibration_criterion(pred_light_pos, gt_light_pos, *, use_pallas=None):
    """JAX/Pallas equivalent of CalibrationCriterion.forward.

    Args:
      pred_light_pos: list of N arrays [B, D], or a stacked [N, B, D] array.
      gt_light_pos:   same structure/shape as pred_light_pos.
      use_pallas: None = auto (Pallas only for non-trivial sizes), True/False = force.

    Returns:
      (loss, loss_dict). `loss` is a JAX f32 scalar; `loss_dict['loss']` carries the
      same JAX scalar.
    """
    pred = _as_stacked(pred_light_pos)
    gt = _as_stacked(gt_light_pos)
    assert pred.shape == gt.shape and pred.ndim == 3, (pred.shape, gt.shape)
    n_items, batch, _ = pred.shape

    if use_pallas is None:
        use_pallas = pred.size >= _PALLAS_MIN_ELEMENTS

    if use_pallas:
        sq_sum = _pallas_sum_sq_diff(pred, gt)
        loss = sq_sum / jnp.float32(n_items * batch)
    else:
        # Small inputs: fused XLA path avoids kernel-launch + HBM round-trip overhead.
        diff = gt.astype(jnp.float32) - pred.astype(jnp.float32)
        loss = jnp.mean(jnp.sum(diff * diff, axis=-1))

    # TODO(synk): PyTorch's loss.item() forces a host sync; we intentionally keep the
    # JAX scalar here so the function stays jit-compatible and async-dispatch friendly.
    loss_dict = {"loss": loss}
    return loss, loss_dict


if __name__ == "__main__":
    key = jax.random.PRNGKey(0)
    k1, k2, k3, k4, k5, k6 = jax.random.split(key, 6)

    def ref_loss(p, g):
        d = g.astype(jnp.float32) - p.astype(jnp.float32)
        return jnp.mean(jnp.sum(d * d, axis=-1))

    # --- Case 1: small f32 shape (N lights, batch B, D=3), forced Pallas path.
    N, B, D = 4, 128, 3
    pred_s = jax.random.normal(k1, (N, B, D), dtype=jnp.float32)
    gt_s = jax.random.normal(k2, (N, B, D), dtype=jnp.float32)
    loss_s, loss_dict_s = calibration_criterion(pred_s, gt_s, use_pallas=True)
    jax.block_until_ready(loss_s)
    assert jnp.allclose(loss_s, ref_loss(pred_s, gt_s), rtol=1e-5, atol=1e-5)
    assert "loss" in loss_dict_s

    # jit-compatibility check (no host sync inside the wrapper).
    jit_loss = jax.jit(
        lambda p, g: calibration_criterion(p, g, use_pallas=True)[0]
    )(pred_s, gt_s)
    jax.block_until_ready(jit_loss)
    assert jnp.allclose(jit_loss, ref_loss(pred_s, gt_s), rtol=1e-5, atol=1e-5)

    # --- Case 2: non-128-aligned total (ragged tail), multi-block grid + row mask.
    N2, B2, D2 = 6, 4097, 3     # total = 73746 -> 576 rows + 18-element XLA tail
    pred_m = jax.random.normal(k3, (N2, B2, D2), dtype=jnp.float32)
    gt_m = jax.random.normal(k4, (N2, B2, D2), dtype=jnp.float32)
    loss_m, _ = calibration_criterion(pred_m, gt_m, use_pallas=True)
    jax.block_until_ready(loss_m)
    assert jnp.allclose(loss_m, ref_loss(pred_m, gt_m), rtol=2e-4, atol=2e-4)

    # --- Case 3: bf16 inputs (dtype-aware block rounding, in-kernel upcast).
    N3, B3, D3 = 4, 64, 3
    pred_b = jax.random.normal(k5, (N3, B3, D3), dtype=jnp.float32).astype(jnp.bfloat16)
    gt_b = jax.random.normal(k6, (N3, B3, D3), dtype=jnp.float32).astype(jnp.bfloat16)
    loss_b, _ = calibration_criterion(pred_b, gt_b, use_pallas=True)
    jax.block_until_ready(loss_b)
    assert jnp.allclose(loss_b, ref_loss(pred_b, gt_b), rtol=1e-3, atol=1e-3)

    # --- Case 4: tiny input matching the module spec; auto-dispatch -> fused XLA path.
    pred_t = pred_s[:, :8, :]
    gt_t = gt_s[:, :8, :]
    loss_t, _ = calibration_criterion(pred_t, gt_t)
    jax.block_until_ready(loss_t)
    assert jnp.allclose(loss_t, ref_loss(pred_t, gt_t), rtol=1e-5, atol=1e-5)

    print("KERNEL_OK")
</pallas_src>

<mosaic_0001>
module attributes {stable_mosaic.version = 11 : i64} {
  func.func @_sq_diff_partial_kernel(%arg0: i32, %arg1: memref<32x128xf32, #tpu.memory_space<vmem>>, %arg2: memref<32x128xf32, #tpu.memory_space<vmem>>, %arg3: memref<1x8x128xf32, #tpu.memory_space<vmem>>) attributes {dimension_semantics = [#tpu.dimension_semantics<parallel>], iteration_bounds = array<i64: 1>, scalar_prefetch = 0 : i64, scratch_operands = 0 : i64, tpu.core_type = #tpu.core_type<tc>, window_params = [{transform_indices = @transform_0, window_bounds = array<i64: 32, 128>}, {transform_indices = @transform_1, window_bounds = array<i64: 32, 128>}, {transform_indices = @transform_2, window_bounds = array<i64: 1, 8, 128>}]} {
    %c32_i32 = arith.constant 32 : i32
    %0 = arith.muli %arg0, %c32_i32 : i32
    %1 = tpu.iota {dimensions = array<i32: 0>} : vector<32x128xi32>
    %cst = arith.constant 0.000000e+00 : f32
    %2 = vector.broadcast %cst : f32 to vector<8x128xf32>
    %c0_i32 = arith.constant 0 : i32
    %c32_i32_0 = arith.constant 32 : i32
    %3 = arith.muli %c0_i32, %c32_i32_0 : i32
    %4 = tpu.assume_multiple %3, 32 : i32
    %5 = arith.index_cast %4 : i32 to index
    %c0 = arith.constant 0 : index
    %6 = vector.load %arg1[%5, %c0] : memref<32x128xf32, #tpu.memory_space<vmem>>, vector<32x128xf32>
    %7 = arith.index_cast %4 : i32 to index
    %c0_1 = arith.constant 0 : index
    %8 = vector.load %arg2[%7, %c0_1] : memref<32x128xf32, #tpu.memory_space<vmem>>, vector<32x128xf32>
    %9 = arith.subf %8, %6 : vector<32x128xf32>
    %10 = arith.mulf %9, %9 : vector<32x128xf32>
    %11 = arith.addi %0, %4 : i32
    %12 = vector.broadcast %11 : i32 to vector<32x128xi32>
    %13 = arith.addi %12, %1 : vector<32x128xi32>
    %c12_i32 = arith.constant 12 : i32
    %14 = vector.broadcast %c12_i32 : i32 to vector<32x128xi32>
    %15 = arith.cmpi slt, %13, %14 : vector<32x128xi32>
    %cst_2 = arith.constant 0.000000e+00 : f32
    %16 = vector.broadcast %cst_2 : f32 to vector<32x128xf32>
    %17 = arith.select %15, %10, %16 : vector<32x128xi1>, vector<32x128xf32>
    %18 = vector.shape_cast %17 : vector<32x128xf32> to vector<4x8x128xf32>
    %cst_3 = arith.constant dense<0.000000e+00> : vector<8x128xf32>
    %19 = vector.multi_reduction <add>, %18, %cst_3 [0] : vector<4x8x128xf32> to vector<8x128xf32>
    %20 = arith.addf %2, %19 : vector<8x128xf32>
    %c1_i32 = arith.constant 1 : i32
    %c0_4 = arith.constant 0 : index
    %c0_5 = arith.constant 0 : index
    %c0_6 = arith.constant 0 : index
    %21 = vector.load %arg3[%c0_4, %c0_5, %c0_6] : memref<1x8x128xf32, #tpu.memory_space<vmem>>, vector<1x8x128xf32>
    %22 = vector.shape_cast %21 : vector<1x8x128xf32> to vector<8x128xf32>
    %23 = vector.shape_cast %20 : vector<8x128xf32> to vector<1x8x128xf32>
    tpu.vector_store %arg3[%c0_4, %c0_5, %c0_6], %23 {strides = array<i32>} : memref<1x8x128xf32, #tpu.memory_space<vmem>>, vector<1x8x128xf32>,
    return
  }
  func.func @transform_0(%arg0: i32) -> (i32, i32) {
    %c0_i32 = arith.constant 0 : i32
    %c0_i32_0 = arith.constant 0 : i32
    return %arg0, %c0_i32 : i32, i32
  }
  func.func @transform_1(%arg0: i32) -> (i32, i32) {
    %c0_i32 = arith.constant 0 : i32
    %c0_i32_0 = arith.constant 0 : i32
    return %arg0, %c0_i32 : i32, i32
  }
  func.func @transform_2(%arg0: i32) -> (i32, i32, i32) {
    %c0_i32 = arith.constant 0 : i32
    %c0_i32_0 = arith.constant 0 : i32
    %c0_i32_1 = arith.constant 0 : i32
    return %arg0, %c0_i32, %c0_i32_0 : i32, i32, i32
  }
}

</mosaic_0001>

<bundles_post_ra>
// kernel: tpu_custom_call.1
= control target key start
LH: loop header
LB: loop body
LE: loop exit
PB: predicated region body
PF: predicated region fallthrough
CT: control target
= control target key end

     0   :  { %7 = vsyncpa [#allocation3], 0  ;;  %s230_s0 = inlined_call_operand.hbm [shape: f32[12,128], index: 0, kind: input, shape index: {}]   ;;  %s231_s1 = inlined_call_operand.hbm [shape: f32[12,128], index: 1, kind: input, shape index: {}]   ;;  %s232_s2 = inlined_call_operand.hbm [shape: f32[1,8,128], index: 2, kind: output, shape index: {}]  }
   0x1   :  { %8 = vsyncpa [#allocation6], 0 }
   0x2   :  { %9 = vsyncpa [#allocation4], 0 }
   0x3   :  { %14 = vsyncadd [#allocation3], 256  ;;  %s174_s9 = smov [#allocation2]   ;;  %s102_s13 = scalar_lea.hbm %s230_s0, 256 }
   0x4   :  { %s15_s10 = sshll.u32 %s174_s9, 4  ;;  %p103_p0 = scmp.ne.s32.totalorder %s230_s0, %s102_s13  ;;  %s16_s10 = int_to_ptr.vmem [resolvable:$true] %s15_s10 }
   0x5   :  { %p106_p1 = scmp.lt.u32.totalorder %s102_s13, %s230_s0 }
   0x7   :  { %p108_p2 = pnand %p106_p1, %p103_p0 }
   0x9   :  { %111 = shalt.err (!%p108_p2)
}
   0xa   :  { %s112_s18 = scalar_lea.vmem %s16_s10, 256  ;;  %s116_s19 = scalar_lea.vmem %s16_s10, 512 }
   0xb   :  { %p113_p3 = scmp.ne.s32.totalorder %s16_s10, %s112_s18  ;;  %p117_p4 = scmp.lt.s32.totalorder %s16_s10, %s16_s10 }
   0xc   :  { %p118_p5 = scmp.lt.s32.totalorder %s116_s19, %s112_s18 }
   0xe   :  { %p119_p6 = por %p118_p5, %p117_p4 }
  0x10   :  { %p120_p7 = pnand %p119_p6, %p113_p3 }
  0x12   :  { %123 = shalt.err (!%p120_p7)
}
  0x13   :  { %s175_s20 = smov 128   ;;  %s176_s21 = smov 8  }
  0x14   :  { %21 = dma.hbm_to_vmem [thread:$0]  %s230_s0, 256, %s16_s10, [#allocation3], %s175_s20, %s175_s20, %s176_s21  }
  0x15   :  { %26 = vsyncadd [#allocation6], 256  ;;  %s177_s24 = smov [#allocation5]   ;;  %s124_s28 = scalar_lea.hbm %s231_s1, 256 }
  0x16   :  { %s27_s25 = sshll.u32 %s177_s24, 4  ;;  %p125_p8 = scmp.ne.s32.totalorder %s231_s1, %s124_s28  ;;  %s28_s25 = int_to_ptr.vmem [resolvable:$true] %s27_s25 }
  0x17   :  { %p128_p9 = scmp.lt.u32.totalorder %s124_s28, %s231_s1 }
  0x19   :  { %p130_p10 = pnand %p128_p9, %p125_p8 }
  0x1b   :  { %133 = shalt.err (!%p130_p10)
}
  0x1c   :  { %s134_s5 = scalar_lea.vmem %s28_s25, 256  ;;  %s138_s0 = scalar_lea.vmem %s28_s25, 512 }
  0x1d   :  { %p135_p11 = scmp.ne.s32.totalorder %s28_s25, %s134_s5  ;;  %p139_p12 = scmp.lt.s32.totalorder %s28_s25, %s28_s25 }
  0x1e   :  { %p140_p13 = scmp.lt.s32.totalorder %s138_s0, %s134_s5 }
  0x20   :  { %p141_p0 = por %p140_p13, %p139_p12 }
  0x22   :  { %p142_p1 = pnand %p141_p0, %p135_p11 }
  0x24   :  { %145 = shalt.err (!%p142_p1)
}
  0x25   :  { %33 = dma.hbm_to_vmem [thread:$0]  %s231_s1, 256, %s28_s25, [#allocation6], %s175_s20, %s175_s20, %s176_s21  }
  0x26   :  { %168 = dma.done.wait [#allocation3], 512  }
  0x27   :  { %169 = vsyncadd [#allocation3], 4294966784 }
  0x28   :  { %170 = dma.done.wait [#allocation6], 512  }
  0x29   :  { %171 = vsyncadd [#allocation6], 4294966784  ;;  %v41_v0 = vlaneseq  ;;  %v46_v3 = vld [vmem:[#allocation2] sm:$0xff]  ;;  %v47_v4 = vld [vmem:[#allocation2 + $0x8] sm:$0xff]  ;;  %s178_s8 = smov [#allocation7]  }
  0x2a   :  { %v50_v5 = vld [vmem:[#allocation5] sm:$0xff]  ;;  %v51_v6 = vld [vmem:[#allocation5 + $0x8] sm:$0xff]  ;;  %s87_s9 = sshll.u32 %s178_s8, 4  ;;  %s88_s9 = int_to_ptr.vmem [resolvable:$true] %s87_s9 }
  0x2b   :  { %v42_v1 = vshrl.u32 %v41_v0, 7  ;;  %v54_v7 = vsub.f32 %v50_v5, %v46_v3  ;;  %v55_v8 = vsub.f32 %v51_v6, %v47_v4  ;;  %s146_s1 = scalar_lea.vmem %s88_s9, 128  ;;  %p151_p3 = scmp.lt.s32.totalorder %s88_s9, %s88_s9 }
  0x2c   :  { %p147_p2 = scmp.ne.s32.totalorder %s88_s9, %s146_s1  ;;  %p152_p4 = scmp.lt.s32.totalorder %s146_s1, %s146_s1 }
  0x2d   :  { %v43_v2 = vadd.s32 8, %v42_v1  ;;  %v58_v9 = vmul.f32 %v54_v7, %v54_v7  ;;  %v59_v10 = vmul.f32 %v55_v8, %v55_v8 }
  0x2e   :  { %p153_p5 = por %p152_p4, %p151_p3 }
  0x2f   :  { %vm69_vm0 = vcmp.lt.s32.totalorder %v43_v2, 12 }
  0x30   :  { %v73_v11 = vsel %vm69_vm0, %v59_v10, 0.0  ;;  %p154_p6 = pnand %p153_p5, %p147_p2 }
  0x31   :  { %v76_v12 = vadd.f32 %v73_v11, %v58_v9 }
  0x33   :  { %80 = vst [vmem:[#allocation7] sm:$0xff] %v76_v12 }
  0x34   :  { %157 = shalt.err (!%p154_p6)
}
  0x35   :  { %s158_s12 = scalar_lea.hbm %s232_s2, 128 }
  0x36   :  { %p159_p7 = scmp.ne.s32.totalorder %s232_s2, %s158_s12  ;;  %p162_p8 = scmp.lt.u32.totalorder %s158_s12, %s232_s2 }
  0x38   :  { %p164_p9 = pnand %p162_p8, %p159_p7 }
  0x3a   :  { %167 = shalt.err (!%p164_p9)
}
  0x3b   :  { %90 = dma.vmem_to_hbm [thread:$0]  %s88_s9, 128, %s232_s2, [#allocation4]  }
  0x3c   :  { %172 = dma.done.wait [#allocation4], 128  }
  0x3d   :  { %173 = vsyncadd [#allocation4], 4294967168 }
  0x3e   :  { %94 = vsyncpa [#allocation3], 1 }
  0x3f   :  { %95 = vsyncpa [#allocation6], 1 }
  0x40   :  { %96 = vsyncpa [#allocation4], 1 }

</bundles_post_ra>
